<compile_context>
chip_gen: v6e
topology: v6e:2x2x1
jax: 0.10.0
libtpu: 0.0.40
codegen_flags: <defaults>
</compile_context>

<pallas_src>
import functools

import jax
import jax.numpy as jnp
from jax.experimental import pallas as pl
from jax.experimental.pallas import tpu as pltpu

_INV_SQRT2 = 0.7071067811865476
_TARGET_VMEM_BYTES = 40 * 1024 * 1024   # fits v7x's 64 MiB physical with headroom


def _gelu_exact(h):
    # Exact (erf) GELU, matching nn.GELU() default. erf goes to the EUP slot.
    return 0.5 * h * (1.0 + jax.lax.erf(h * _INV_SQRT2))


def _mlp_kernel_resident(x_ref, w1_ref, b1_ref, w2_ref, b2_ref, o_ref):
    # x_ref: (tm, Dp)  w1_ref: (Dp, Hp)  b1_ref: (1, Hp) f32
    # w2_ref: (Hp, Dp) b2_ref: (1, Dp) f32  o_ref: (tm, Dp)
    h = jnp.dot(x_ref[...], w1_ref[...], preferred_element_type=jnp.float32)
    h = _gelu_exact(h + b1_ref[...])
    y = jnp.dot(h.astype(w2_ref.dtype), w2_ref[...],
                preferred_element_type=jnp.float32)
    o_ref[...] = (y + b2_ref[...]).astype(o_ref.dtype)


def _mlp_kernel_tiled(x_ref, w1_ref, b1_ref, w2_ref, b2_ref, o_ref, acc_ref):
    # x_ref: (tm, Dp)  w1_ref: (Dp, th)  b1_ref: (1, th) f32
    # w2_ref: (th, Dp) b2_ref: (1, Dp) f32  o_ref: (tm, Dp)  acc_ref: (tm, Dp) f32
    hstep = pl.program_id(1)

    h = jnp.dot(x_ref[...], w1_ref[...], preferred_element_type=jnp.float32)
    h = _gelu_exact(h + b1_ref[...])
    part = jnp.dot(h.astype(w2_ref.dtype), w2_ref[...],
                   preferred_element_type=jnp.float32)

    @pl.when(hstep == 0)
    def _():                      # overwrite on first step: no zero-init pass
        acc_ref[...] = part

    @pl.when(hstep > 0)
    def _():
        acc_ref[...] += part

    @pl.when(hstep == pl.num_programs(1) - 1)
    def _():
        o_ref[...] = (acc_ref[...] + b2_ref[...]).astype(o_ref.dtype)


def _round_up(x, m):
    return (x + m - 1) // m * m


def _choose_row_tile(M, block_rows, per_row_bytes, row_budget_bytes):
    cap = row_budget_bytes // max(per_row_bytes, 1)
    cap = max(8, cap - cap % 8)
    tm = min(block_rows, cap, _round_up(M, 8))
    tm = max(8, tm - tm % 8)
    # Prefer a tile that divides M exactly (avoids jnp.pad + garbage rows).
    if M % tm != 0:
        for cand in range(tm, max(8, tm // 2) - 1, -8):
            if M % cand == 0:
                tm = cand
                break
    # Prefer >= 2 row tiles (v7x has 2 TensorCores sharded over the parallel axis),
    # but only when halving does not reintroduce padding.
    if _round_up(M, tm) // tm < 2:
        half = tm // 2
        if half >= 8 and half % 8 == 0 and M % half == 0:
            tm = half
    return tm


@functools.partial(
    jax.jit,
    static_argnames=("block_rows", "block_hidden", "compute_dtype",
                     "max_resident_weight_bytes"))
def mlp_pallas(x, w1, b1, w2, b2, *, block_rows=1024, block_hidden=512,
               compute_dtype=None, max_resident_weight_bytes=16 * 1024 * 1024):
    """x: (B, S, D); w1: (H, D); b1: (H,); w2: (D, H); b2: (D,)  (PyTorch layouts)."""
    B, S, D = x.shape
    H = w1.shape[0]
    M = B * S

    out_dtype = x.dtype
    cdt = jnp.dtype(out_dtype) if compute_dtype is None else jnp.dtype(compute_dtype)
    item = cdt.itemsize
    out_item = jnp.dtype(out_dtype).itemsize

    # Lane-dense output / MXU-aligned dims.
    Dp = _round_up(D, 128)
    Hp_full = _round_up(H, 128)

    # Resident path when both (transposed) weight matrices comfortably fit VMEM.
    resident_weight_bytes = 2 * Dp * Hp_full * item
    use_resident = resident_weight_bytes <= max_resident_weight_bytes

    if use_resident:
        th = Hp_full
        Hp = Hp_full
    else:
        th = min(block_hidden, Hp_full)
        th = max(128, th - th % 128)          # th always a multiple of 128
        Hp = _round_up(H, th)

    # One-time canonical-layout transposes (amortized across grid steps / calls).
    w1t = w1.T.astype(cdt)                    # (D, H)
    w2t = w2.T.astype(cdt)                    # (H, D)
    if Dp != D or Hp != H:
        w1t = jnp.pad(w1t, ((0, Dp - D), (0, Hp - H)))
        w2t = jnp.pad(w2t, ((0, Hp - H), (0, Dp - D)))

    b1p = b1.astype(jnp.float32).reshape(1, H)
    b2p = b2.astype(jnp.float32).reshape(1, D)
    if Hp != H:
        b1p = jnp.pad(b1p, ((0, 0), (0, Hp - H)))   # gelu(0)=0 -> pad rows inert
    if Dp != D:
        b2p = jnp.pad(b2p, ((0, 0), (0, Dp - D)))

    x2 = x.reshape(M, D).astype(cdt)          # contiguous reshape: no HBM copy
    if Dp != D:
        x2 = jnp.pad(x2, ((0, 0), (0, Dp - D)))

    # VMEM accounting (count 2x buffering for every BlockSpec, + f32 accumulator).
    weight_buf_bytes = 2 * (Dp * th + th * Dp) * item + 2 * (th + Dp) * 4
    per_row_bytes = Dp * (2 * item + 2 * out_item) + (0 if use_resident else Dp * 4)
    row_budget = max(_TARGET_VMEM_BYTES - weight_buf_bytes, 2 * 1024 * 1024)

    tm = _choose_row_tile(M, block_rows, per_row_bytes, row_budget)
    m_pad = _round_up(M, tm)
    if m_pad != M:
        x2 = jnp.pad(x2, ((0, m_pad - M), (0, 0)))

    est_bytes = weight_buf_bytes + tm * per_row_bytes
    vmem_limit = int(min(64 * 1024 * 1024,
                         max(est_bytes * 5 // 4 + (2 << 20), 16 * 1024 * 1024)))

    if use_resident:
        grid = (m_pad // tm,)
        out = pl.pallas_call(
            _mlp_kernel_resident,
            out_shape=jax.ShapeDtypeStruct((m_pad, Dp), out_dtype),
            grid_spec=pltpu.PrefetchScalarGridSpec(
                num_scalar_prefetch=0,
                grid=grid,
                in_specs=[
                    pl.BlockSpec((tm, Dp), lambda i: (i, 0)),   # x rows
                    pl.BlockSpec((Dp, Hp), lambda i: (0, 0)),   # w1^T (resident)
                    pl.BlockSpec((1, Hp), lambda i: (0, 0)),    # b1
                    pl.BlockSpec((Hp, Dp), lambda i: (0, 0)),   # w2^T (resident)
                    pl.BlockSpec((1, Dp), lambda i: (0, 0)),    # b2
                ],
                out_specs=pl.BlockSpec((tm, Dp), lambda i: (i, 0)),
            ),
            compiler_params=pltpu.CompilerParams(
                dimension_semantics=("parallel",),
                vmem_limit_bytes=vmem_limit),
        )(x2, w1t, b1p, w2t, b2p)
    else:
        grid = (m_pad // tm, Hp // th)        # rows parallel, hidden = reduction last
        out = pl.pallas_call(
            _mlp_kernel_tiled,
            out_shape=jax.ShapeDtypeStruct((m_pad, Dp), out_dtype),
            grid_spec=pltpu.PrefetchScalarGridSpec(
                num_scalar_prefetch=0,
                grid=grid,
                in_specs=[
                    pl.BlockSpec((tm, Dp), lambda i, h: (i, 0)),  # x rows
                    pl.BlockSpec((Dp, th), lambda i, h: (0, h)),  # w1^T cols
                    pl.BlockSpec((1, th), lambda i, h: (0, h)),   # b1 slice
                    pl.BlockSpec((th, Dp), lambda i, h: (h, 0)),  # w2^T rows
                    pl.BlockSpec((1, Dp), lambda i, h: (0, 0)),   # b2
                ],
                out_specs=pl.BlockSpec((tm, Dp), lambda i, h: (i, 0)),
                scratch_shapes=[pltpu.VMEM((tm, Dp), jnp.float32)],
            ),
            compiler_params=pltpu.CompilerParams(
                dimension_semantics=("parallel", "arbitrary"),
                vmem_limit_bytes=vmem_limit),
        )(x2, w1t, b1p, w2t, b2p)

    if m_pad != M or Dp != D:
        out = out[:M, :D]
    return out.reshape(B, S, D)


def mlp_reference(x, w1, b1, w2, b2):
    hp = jax.lax.Precision.HIGHEST
    h = jnp.einsum("bsd,hd->bsh", x, w1, precision=hp) + b1
    h = jax.nn.gelu(h, approximate=False)
    return jnp.einsum("bsh,dh->bsd", h, w2, precision=hp) + b2


if __name__ == "__main__":
    # Small shapes consistent with the MLP-Mixer token/channel MLP:
    # batch=2, seq(tokens)=8, dim=32, hidden_dim=64
    B, S, D, H = 2, 8, 32, 64
    key = jax.random.PRNGKey(0)
    kx, k1, k2, k3, k4 = jax.random.split(key, 5)

    x = jax.random.normal(kx, (B, S, D), dtype=jnp.float32)
    bound1 = 1.0 / float(D) ** 0.5
    bound2 = 1.0 / float(H) ** 0.5
    w1 = jax.random.uniform(k1, (H, D), minval=-bound1, maxval=bound1, dtype=jnp.float32)
    b1 = jax.random.uniform(k2, (H,), minval=-bound1, maxval=bound1, dtype=jnp.float32)
    w2 = jax.random.uniform(k3, (D, H), minval=-bound2, maxval=bound2, dtype=jnp.float32)
    b2 = jax.random.uniform(k4, (D,), minval=-bound2, maxval=bound2, dtype=jnp.float32)

    ref = mlp_reference(x, w1, b1, w2, b2)

    # 1) f32, weights-resident fast path (parity with the PyTorch forward).
    out = jax.block_until_ready(mlp_pallas(x, w1, b1, w2, b2))
    assert out.shape == (B, S, D)
    assert jnp.allclose(out, ref, atol=1e-4, rtol=1e-4), "f32 resident path mismatch"

    # 2) bf16 MXU operands with f32 accumulation (the v6e/v7x throughput path).
    out_bf16 = jax.block_until_ready(
        mlp_pallas(x, w1, b1, w2, b2, compute_dtype=jnp.bfloat16))
    assert out_bf16.shape == (B, S, D)
    assert jnp.allclose(out_bf16, ref, atol=1e-1, rtol=1e-1), "bf16 path mismatch"

    # 3) Hidden-tiled accumulator path (forced), with a multi-step H reduction.
    H2 = 256
    k5, k6 = jax.random.split(k4)
    w1b = jax.random.uniform(k5, (H2, D), minval=-bound1, maxval=bound1, dtype=jnp.float32)
    b1b = jnp.zeros((H2,), jnp.float32)
    w2b = jax.random.uniform(k6, (D, H2), minval=-1.0 / 16, maxval=1.0 / 16,
                             dtype=jnp.float32)
    ref2 = mlp_reference(x, w1b, b1b, w2b, b2)
    out2 = jax.block_until_ready(
        mlp_pallas(x, w1b, b1b, w2b, b2, block_hidden=128,
                   max_resident_weight_bytes=0))
    assert out2.shape == (B, S, D)
    assert jnp.allclose(out2, ref2, atol=1e-4, rtol=1e-4), "tiled path mismatch"

    print("KERNEL_OK")
</pallas_src>

<mosaic_0001>
module attributes {stable_mosaic.version = 11 : i64} {
  func.func @_mlp_kernel_resident(%arg0: i32, %arg1: memref<8x128xf32, #tpu.memory_space<vmem>>, %arg2: memref<128x128xf32, #tpu.memory_space<vmem>>, %arg3: memref<1x128xf32, #tpu.memory_space<vmem>>, %arg4: memref<128x128xf32, #tpu.memory_space<vmem>>, %arg5: memref<1x128xf32, #tpu.memory_space<vmem>>, %arg6: memref<8x128xf32, #tpu.memory_space<vmem>>) attributes {dimension_semantics = [#tpu.dimension_semantics<parallel>], iteration_bounds = array<i64: 2>, scalar_prefetch = 0 : i64, scratch_operands = 0 : i64, tpu.core_type = #tpu.core_type<tc>, window_params = [{transform_indices = @transform_0, window_bounds = array<i64: 8, 128>}, {pipeline_mode = #tpu.pipeline_mode<synchronous>, transform_indices = @transform_1, window_bounds = array<i64: 128, 128>}, {pipeline_mode = #tpu.pipeline_mode<synchronous>, transform_indices = @transform_2, window_bounds = array<i64: 1, 128>}, {pipeline_mode = #tpu.pipeline_mode<synchronous>, transform_indices = @transform_3, window_bounds = array<i64: 128, 128>}, {pipeline_mode = #tpu.pipeline_mode<synchronous>, transform_indices = @transform_4, window_bounds = array<i64: 1, 128>}, {transform_indices = @transform_5, window_bounds = array<i64: 8, 128>}]} {
    %c0 = arith.constant 0 : index
    %c0_0 = arith.constant 0 : index
    %0 = vector.load %arg1[%c0, %c0_0] : memref<8x128xf32, #tpu.memory_space<vmem>>, vector<8x128xf32>
    %c0_1 = arith.constant 0 : index
    %c0_2 = arith.constant 0 : index
    %1 = vector.load %arg2[%c0_1, %c0_2] : memref<128x128xf32, #tpu.memory_space<vmem>>, vector<128x128xf32>
    %cst = arith.constant dense<0.000000e+00> : vector<8x128xf32>
    %2 = tpu.matmul %0, %1, %cst {dimension_numbers = #tpu.dot_dimension_numbers<[1], [0], [0], [1], [0, 0, 1, 1], [], []>} : vector<8x128xf32>, vector<128x128xf32>, vector<8x128xf32> -> vector<8x128xf32>
    %c0_3 = arith.constant 0 : index
    %c0_4 = arith.constant 0 : index
    %3 = vector.load %arg3[%c0_3, %c0_4] : memref<1x128xf32, #tpu.memory_space<vmem>>, vector<1x128xf32>
    %4 = vector.broadcast %3 : vector<1x128xf32> to vector<8x128xf32>
    %5 = arith.addf %2, %4 : vector<8x128xf32>
    %cst_5 = arith.constant 5.000000e-01 : f32
    %6 = vector.broadcast %cst_5 : f32 to vector<8x128xf32>
    %7 = arith.mulf %6, %5 : vector<8x128xf32>
    %cst_6 = arith.constant 0.707106769 : f32
    %8 = vector.broadcast %cst_6 : f32 to vector<8x128xf32>
    %9 = arith.mulf %5, %8 : vector<8x128xf32>
    %10 = math.erf %9 : vector<8x128xf32>
    %cst_7 = arith.constant 1.000000e+00 : f32
    %11 = vector.broadcast %cst_7 : f32 to vector<8x128xf32>
    %12 = arith.addf %11, %10 : vector<8x128xf32>
    %13 = arith.mulf %7, %12 : vector<8x128xf32>
    %c0_8 = arith.constant 0 : index
    %c0_9 = arith.constant 0 : index
    %14 = vector.load %arg4[%c0_8, %c0_9] : memref<128x128xf32, #tpu.memory_space<vmem>>, vector<128x128xf32>
    %cst_10 = arith.constant dense<0.000000e+00> : vector<8x128xf32>
    %15 = tpu.matmul %13, %14, %cst_10 {dimension_numbers = #tpu.dot_dimension_numbers<[1], [0], [0], [1], [0, 0, 1, 1], [], []>} : vector<8x128xf32>, vector<128x128xf32>, vector<8x128xf32> -> vector<8x128xf32>
    %c0_11 = arith.constant 0 : index
    %c0_12 = arith.constant 0 : index
    %16 = vector.load %arg5[%c0_11, %c0_12] : memref<1x128xf32, #tpu.memory_space<vmem>>, vector<1x128xf32>
    %17 = vector.broadcast %16 : vector<1x128xf32> to vector<8x128xf32>
    %18 = arith.addf %15, %17 : vector<8x128xf32>
    %c0_13 = arith.constant 0 : index
    %c0_14 = arith.constant 0 : index
    %19 = vector.load %arg6[%c0_13, %c0_14] : memref<8x128xf32, #tpu.memory_space<vmem>>, vector<8x128xf32>
    tpu.vector_store %arg6[%c0_13, %c0_14], %18 {strides = array<i32>} : memref<8x128xf32, #tpu.memory_space<vmem>>, vector<8x128xf32>,
    return
  }
  func.func @transform_0(%arg0: i32) -> (i32, i32) {
    %c0_i32 = arith.constant 0 : i32
    %c0_i32_0 = arith.constant 0 : i32
    return %arg0, %c0_i32 : i32, i32
  }
  func.func @transform_1(%arg0: i32) -> (i32, i32) {
    %c0_i32 = arith.constant 0 : i32
    %c0_i32_0 = arith.constant 0 : i32
    %c0_i32_1 = arith.constant 0 : i32
    return %c0_i32, %c0_i32_0 : i32, i32
  }
  func.func @transform_2(%arg0: i32) -> (i32, i32) {
    %c0_i32 = arith.constant 0 : i32
    %c0_i32_0 = arith.constant 0 : i32
    %c0_i32_1 = arith.constant 0 : i32
    return %c0_i32, %c0_i32_0 : i32, i32
  }
  func.func @transform_3(%arg0: i32) -> (i32, i32) {
    %c0_i32 = arith.constant 0 : i32
    %c0_i32_0 = arith.constant 0 : i32
    %c0_i32_1 = arith.constant 0 : i32
    return %c0_i32, %c0_i32_0 : i32, i32
  }
  func.func @transform_4(%arg0: i32) -> (i32, i32) {
    %c0_i32 = arith.constant 0 : i32
    %c0_i32_0 = arith.constant 0 : i32
    %c0_i32_1 = arith.constant 0 : i32
    return %c0_i32, %c0_i32_0 : i32, i32
  }
  func.func @transform_5(%arg0: i32) -> (i32, i32) {
    %c0_i32 = arith.constant 0 : i32
    %c0_i32_0 = arith.constant 0 : i32
    return %arg0, %c0_i32 : i32, i32
  }
}

</mosaic_0001>

<bundles_post_ra>
// kernel: mlp_pallas.1
= control target key start
LH: loop header
LB: loop body
LE: loop exit
PB: predicated region body
PF: predicated region fallthrough
CT: control target
= control target key end

     0   :  { %s633_s18 = smov 0   ;;  %s797_s0 = inlined_call_operand.vmem [shape: f32[16,128], index: 0, kind: input, shape index: {}]   ;;  %s798_s1 = inlined_call_operand.vmem [shape: f32[128,128], index: 1, kind: input, shape index: {}]   ;;  %s799_s2 = inlined_call_operand.vmem [shape: f32[1,128], index: 2, kind: input, shape index: {}]   ;;  %s800_s3 = inlined_call_operand.vmem [shape: f32[128,128], index: 3, kind: input, shape index: {}]   ;;  %s801_s4 = inlined_call_operand.vmem [shape: f32[1,128], index: 4, kind: input, shape index: {}]   ;;  %s802_s5 = inlined_call_operand.vmem [shape: f32[16,128], index: 5, kind: output, shape index: {}]  }
   0x1 LB: > { %s466_s19 = sadd.s32 4294967295, %s599_s18   ;;  %p470_p0 = scmp.ge.s32.totalorder %s599_s18, 1  ;;  %s599_s18 = sphi %s633_s18, %s15_s18  }
   0x2   : > { %p186_p1 = scmp.lt.s32.totalorder %s599_s18, 3 }
   0x4   : > { %p187_p2 = pnand %p470_p0, %p186_p1 }
   0x5   : > { %p212_p3 = scmp.lt.s32.totalorder (!%p187_p2), %s466_s19, 1 }
   0x6   : > { %190 = sbr.rel (%p187_p2) target bundleno = 455 (0x1c7), region = 40 }
   0xb   : > { %v236_v0 = vld [vmem:[%s798_s1 + $0x78] sm:$0xff]  ;;  %v601_v1 = vmov 0.0   ;;  %v235_v2 = vld [vmem:[%s798_s1 + $0x70] sm:$0xff]  ;;  %vm602_vm0 = vmmov 0   ;;  %v234_v3 = vld [vmem:[%s798_s1 + $0x68] sm:$0xff]  ;;  %s804_s19 = smov (!%p212_p3, %s466_s19), 1 }
   0xc   : > { %511 = vmatprep.subr.mxu0 %v601_v1  ;;  %543 = vmatprep.mubr.msk.f32.mxu0 %vm602_vm0, %v601_v1  ;;  %v233_v4 = vld [vmem:[%s798_s1 + $0x60] sm:$0xff]  ;;  %v334_v5 = vld [vmem:[%s800_s3 + $0x78] sm:$0xff]  ;;  %v333_v6 = vld [vmem:[%s800_s3 + $0x70] sm:$0xff]  ;;  %s471_s6 = sshll.u32 %s804_s19, 3 }
   0xd   : > { %512 = vmatpush3.msra.mxu0 %v236_v0  ;;  %546 = vmatprep.subr.mxu1 %v601_v1  ;;  %v232_v7 = vld [vmem:[%s798_s1 + $0x58] sm:$0xff]  ;;  %v332_v8 = vld [vmem:[%s800_s3 + $0x68] sm:$0xff]  ;;  %v231_v9 = vld [vmem:[%s798_s1 + $0x50] sm:$0xff]  ;;  %s215_s13 = scalar_lea.vmem %s797_s0, %s471_s6  ;;  %s219_s26 = scalar_lea.vmem %s802_s5, %s471_s6 }
   0xe   : > { %513 = vmatprep.subr.mxu0 %v601_v1  ;;  %578 = vmatprep.mubr.msk.f32.mxu1 %vm602_vm0, %v601_v1  ;;  %v331_v10 = vld [vmem:[%s800_s3 + $0x60] sm:$0xff]  ;;  %v230_v11 = vld [vmem:[%s798_s1 + $0x48] sm:$0xff]  ;;  %v228_v13 = vld [vmem:[%s798_s1 + $0x38] sm:$0xff] }
   0xf   : > { %514 = vmatpush3.msra.mxu0 %v235_v2  ;;  %547 = vmatpush3.msra.mxu1 %v334_v5  ;;  %v229_v12 = vld [vmem:[%s798_s1 + $0x40] sm:$0xff]  ;;  %v227_v14 = vld [vmem:[%s798_s1 + $0x30] sm:$0xff]  ;;  %v226_v15 = vld [vmem:[%s798_s1 + $0x28] sm:$0xff] }
  0x10   : > { %515 = vmatprep.subr.mxu0 %v601_v1  ;;  %548 = vmatprep.subr.mxu1 %v601_v1  ;;  %v225_v16 = vld [vmem:[%s798_s1 + $0x20] sm:$0xff]  ;;  %v224_v17 = vld [vmem:[%s798_s1 + $0x18] sm:$0xff]  ;;  %v223_v18 = vld [vmem:[%s798_s1 + $0x10] sm:$0xff] }
  0x11   : > { %516 = vmatpush3.msra.mxu0 %v234_v3  ;;  %549 = vmatpush3.msra.mxu1 %v333_v6  ;;  %v222_v19 = vld [vmem:[%s798_s1 + $0x8] sm:$0xff]  ;;  %v221_v20 = vld [vmem:[%s798_s1] sm:$0xff]  ;;  %v330_v22 = vld [vmem:[%s800_s3 + $0x58] sm:$0xff] }
  0x12   : > { %517 = vmatprep.subr.mxu0 %v601_v1  ;;  %550 = vmatprep.subr.mxu1 %v601_v1  ;;  %v220_v21 = vld [vmem:[%s215_s13] sm:$0xff]  ;;  %v329_v23 = vld [vmem:[%s800_s3 + $0x50] sm:$0xff]  ;;  %v328_v24 = vld [vmem:[%s800_s3 + $0x48] sm:$0xff] }
  0x13   : > { %518 = vmatpush3.msra.mxu0 %v233_v4  ;;  %551 = vmatpush3.msra.mxu1 %v332_v8  ;;  %v327_v25 = vld [vmem:[%s800_s3 + $0x40] sm:$0xff]  ;;  %v326_v26 = vld [vmem:[%s800_s3 + $0x38] sm:$0xff]  ;;  %v325_v27 = vld [vmem:[%s800_s3 + $0x30] sm:$0xff] }
  0x14   : > { %519 = vmatprep.subr.mxu0 %v601_v1  ;;  %552 = vmatprep.subr.mxu1 %v601_v1  ;;  %v324_v28 = vld [vmem:[%s800_s3 + $0x28] sm:$0xff]  ;;  %v323_v29 = vld [vmem:[%s800_s3 + $0x20] sm:$0xff]  ;;  %v322_v30 = vld [vmem:[%s800_s3 + $0x18] sm:$0xff] }
  0x15   : > { %520 = vmatpush3.msra.mxu0 %v232_v7  ;;  %553 = vmatpush3.msra.mxu1 %v331_v10  ;;  %v321_v31 = vld [vmem:[%s800_s3 + $0x10] sm:$0xff]  ;;  %v320_v32 = vld [vmem:[%s800_s3 + $0x8] sm:$0xff]  ;;  %v319_v33 = vld [vmem:[%s800_s3] sm:$0xff] }
  0x16   : > { %521 = vmatprep.subr.mxu0 %v601_v1  ;;  %554 = vmatprep.subr.mxu1 %v601_v1  ;;  %v473_v34 = vld [vmem:[%s799_s2] ss:$0 sm:$0xff] }
  0x17   : > { %522 = vmatpush3.msra.mxu0 %v231_v9  ;;  %555 = vmatpush3.msra.mxu1 %v330_v22  ;;  %v474_v43 = vld [vmem:[%s801_s4] ss:$0 sm:$0xff] }
  0x18   : > { %523 = vmatprep.subr.mxu0 %v601_v1  ;;  %556 = vmatprep.subr.mxu1 %v601_v1 }
  0x19   : > { %524 = vmatpush3.msra.mxu0 %v230_v11  ;;  %557 = vmatpush3.msra.mxu1 %v329_v23 }
  0x1a   : > { %525 = vmatprep.subr.mxu0 %v601_v1  ;;  %558 = vmatprep.subr.mxu1 %v601_v1 }
  0x1b   : > { %526 = vmatpush3.msra.mxu0 %v229_v12  ;;  %559 = vmatpush3.msra.mxu1 %v328_v24 }
  0x1c   : > { %527 = vmatprep.subr.mxu0 %v601_v1  ;;  %560 = vmatprep.subr.mxu1 %v601_v1 }
  0x1d   : > { %528 = vmatpush3.msra.mxu0 %v228_v13  ;;  %561 = vmatpush3.msra.mxu1 %v327_v25 }
  0x1e   : > { %529 = vmatprep.subr.mxu0 %v601_v1  ;;  %562 = vmatprep.subr.mxu1 %v601_v1 }
  0x1f   : > { %530 = vmatpush3.msra.mxu0 %v227_v14  ;;  %563 = vmatpush3.msra.mxu1 %v326_v26 }
  0x20   : > { %531 = vmatprep.subr.mxu0 %v601_v1  ;;  %564 = vmatprep.subr.mxu1 %v601_v1 }
  0x21   : > { %532 = vmatpush3.msra.mxu0 %v226_v15  ;;  %565 = vmatpush3.msra.mxu1 %v325_v27 }
  0x22   : > { %533 = vmatprep.subr.mxu0 %v601_v1  ;;  %566 = vmatprep.subr.mxu1 %v601_v1 }
  0x23   : > { %534 = vmatpush3.msra.mxu0 %v225_v16  ;;  %567 = vmatpush3.msra.mxu1 %v324_v28 }
  0x24   : > { %535 = vmatprep.subr.mxu0 %v601_v1  ;;  %568 = vmatprep.subr.mxu1 %v601_v1 }
  0x25   : > { %536 = vmatpush3.msra.mxu0 %v224_v17  ;;  %569 = vmatpush3.msra.mxu1 %v323_v29 }
  0x26   : > { %537 = vmatprep.subr.mxu0 %v601_v1  ;;  %570 = vmatprep.subr.mxu1 %v601_v1 }
  0x27   : > { %538 = vmatpush3.msra.mxu0 %v223_v18  ;;  %571 = vmatpush3.msra.mxu1 %v322_v30 }
  0x28   : > { %539 = vmatprep.subr.mxu0 %v601_v1  ;;  %572 = vmatprep.subr.mxu1 %v601_v1 }
  0x29   : > { %540 = vmatpush3.msra.mxu0 %v222_v19  ;;  %573 = vmatpush3.msra.mxu1 %v321_v31 }
  0x2a   : > { %541 = vmatprep.subr.mxu0 %v601_v1  ;;  %574 = vmatprep.subr.mxu1 %v601_v1 }
  0x2b   : > { %542 = vmatpush3.msra.mxu0 %v221_v20  ;;  %575 = vmatpush3.msra.mxu1 %v320_v32 }
  0x2c   : > { %544 = vmatmul.mubr.f32.vlgmr.msra.gmra.mxu0 %v220_v21  ;;  %576 = vmatprep.subr.mxu1 %v601_v1 }
  0x2d   : > { %577 = vmatpush3.msra.mxu1 %v319_v33 }
  0xec   : > { %v310_v35 = vpop.f32.mrf.mxu0 }
  0xed   : > { %v311_v36 = vadd.f32 %v473_v34, %v310_v35 }
  0xee   : > { %v545_v37 = vpop.f32.mrf.mxu0 }
  0xef   : > { %v315_v38 = vmul.f32 0.70710677, %v311_v36  ;;  %v314_v40 = vmul.f32 0.5, %v311_v36 }
  0xf1   : > { %591 = verf.f32 %v315_v38 }
  0xfe   : > { %v592_v39 = vpop.eup %591 }
  0xff   : > { %v317_v41 = vadd.f32 1.0, %v592_v39 }
 0x101   : > { %v318_v42 = vmul.f32 %v317_v41, %v314_v40 }
 0x103   : > { %579 = vmatmul.mubr.f32.vlgmr.msra.gmra.mxu1 %v318_v42 }
 0x1c3   : > { %v408_v44 = vpop.f32.mrf.mxu1 }
 0x1c4   : > { %v409_v45 = vadd.f32 %v474_v43, %v408_v44 }
 0x1c5   : > { %v580_v46 = vpop.f32.mrf.mxu1 }
 0x1c6   : > { %412 = vst [vmem:[%s219_s26] sm:$0xff] %v409_v45 }
 0x1c7 PF: > { %s15_s18 = sadd.s32 1, %s599_s18  }
 0x1c8   : > { %p12_p4 = scmp.ge.s32.totalorder %s15_s18, 4  }
 0x1ca   :  { %14 = sbr.rel (!%p12_p4) target bundleno = 1 (0x1), region = 70 }

</bundles_post_ra>
